<compile_context>
chip_gen: v7x
topology: tpu7x:2x2x1
jax: 0.10.0
libtpu: 0.0.40
codegen_flags: <defaults>
</compile_context>

<pallas_src>
import jax
import jax.numpy as jnp
from jax.experimental import pallas as pl
from jax.experimental.pallas import tpu as pltpu

_LN_EPS = 1e-6


# --------------------------------------------------------------------------- #
# Kernels
# --------------------------------------------------------------------------- #
def _ln_modulate(x_ref, shift_ref, gain_ref):
    """LayerNorm (no affine, eps=1e-6) + adaLN modulate in f32.  Returns (TH, D).

    Single-pass statistics: mean = E[x], var = E[x^2] - mean^2 (one reduction
    pass over the tile, one fewer live (TH, D) f32 temporary).
    """
    x = x_ref[0].astype(jnp.float32)                      # (TH, D)
    d = x.shape[-1]
    inv_d = jnp.float32(1.0 / d)
    mean = jnp.sum(x, axis=-1, keepdims=True) * inv_d     # (TH, 1)
    ex2 = jnp.sum(x * x, axis=-1, keepdims=True) * inv_d  # (TH, 1)
    var = ex2 - mean * mean
    rstd = jax.lax.rsqrt(var + _LN_EPS)                   # (TH, 1)
    gain = gain_ref[0].astype(jnp.float32)                # (1, D)  == 1 + scale
    shift = shift_ref[0].astype(jnp.float32)              # (1, D)
    return (x - mean) * rstd * gain + shift               # (TH, D)


def final_layer_kernel_t(shift_ref, gain_ref, x_ref, w_lin_t_ref, out_ref):
    """Transposed-output path (O < 128).

    shift/gain: (1, 1, D)   x: (1, TH, D)   w_lin_t: (O, D)   out: (1, O, TH)
    """
    xm = _ln_modulate(x_ref, shift_ref, gain_ref).astype(w_lin_t_ref.dtype)
    # out_T[o, n] = sum_d W[o, d] * xm[n, d]  (A @ B^T, contract last dims)
    out_t = jax.lax.dot_general(
        w_lin_t_ref[...], xm,
        dimension_numbers=(((1,), (1,)), ((), ())),
        preferred_element_type=jnp.float32)               # (O, TH)
    out_ref[0] = out_t.astype(out_ref.dtype)


def final_layer_kernel_n(shift_ref, gain_ref, x_ref, w_lin_ref, out_ref):
    """Natural-output path (O a multiple of 128 -> already lane-dense).

    shift/gain: (1, 1, D)   x: (1, TH, D)   w_lin: (D, O)   out: (1, TH, O)
    """
    xm = _ln_modulate(x_ref, shift_ref, gain_ref).astype(w_lin_ref.dtype)
    out = jnp.dot(xm, w_lin_ref[...], preferred_element_type=jnp.float32)
    out_ref[0] = out.astype(out_ref.dtype)


# --------------------------------------------------------------------------- #
# Tile sizing / VMEM budgeting
# --------------------------------------------------------------------------- #
def _vmem_budget_bytes():
    """Chip-aware VMEM budget (v5e/v6e: 128 MiB phys, v7x: 64 MiB)."""
    try:
        cap = int(pltpu.get_tpu_info().vmem_capacity_bytes)
    except Exception:
        cap = 64 << 20  # conservative (v7x per-TC) fallback
    # ~60% of physical, with headroom for Mosaic internal scratch; never exceed
    # 100 MiB so we stay well under the 128 MiB ceiling on v5e/v6e.
    return max(16 << 20, min(int(cap * 0.6), 100 << 20))


def _choose_row_tile(hw, d, o, x_bytes, out_bytes, budget, max_tile):
    """Largest TH (multiple of 128, dividing HW) whose footprint fits `budget`.

    Footprint per row of TH: double-buffered x input + double-buffered output
    block + ~3 live (TH, D) f32 intermediates inside the kernel.
    Returns None if HW has no multiple-of-128 divisor (caller falls back to XLA).
    """
    per_row = 2 * d * x_bytes + 2 * o * out_bytes + 3 * d * 4
    cap = max(128, min(max_tile, budget // max(per_row, 1)))
    cap = (cap // 128) * 128
    th = cap
    while th >= 128:
        if hw % th == 0:
            return th
        th -= 128
    return None


# --------------------------------------------------------------------------- #
# Wrapper
# --------------------------------------------------------------------------- #
def _final_layer_xla(x_f, shift, gain, w_lin, out_shape):
    """Plain-XLA fallback for degenerate HW (no lane-dense tiling available)."""
    xf = x_f.astype(jnp.float32)
    mean = xf.mean(-1, keepdims=True)
    var = (xf * xf).mean(-1, keepdims=True) - mean * mean
    xn = (xf - mean) * jax.lax.rsqrt(var + _LN_EPS)
    xm = xn * gain.astype(jnp.float32) + shift.astype(jnp.float32)
    out = jnp.dot(xm.astype(w_lin.dtype), w_lin, preferred_element_type=jnp.float32)
    return out.astype(x_f.dtype).reshape(out_shape)


def final_layer(x_BTHWD, emb_BTD, w_mod_D_2D, w_lin_D_O, *, max_row_tile=1024):
    """x: (B,T,H,W,D), emb: (B,T,D), w_mod: (D,2D) [in,out], w_lin: (D,O) [in,out]."""
    B, T, H, W, D = x_BTHWD.shape
    O = w_lin_D_O.shape[1]
    BT, HW = B * T, H * W

    x_f = x_BTHWD.reshape(BT, HW, D)

    # --- hoisted adaLN modulation: one (BT, D) @ (D, 2D) matmul (f32 acc) ------
    e = emb_BTD.reshape(BT, D).astype(jnp.float32)
    e_silu = (e * jax.nn.sigmoid(e)).astype(w_mod_D_2D.dtype)
    mod = jnp.dot(e_silu, w_mod_D_2D, preferred_element_type=jnp.float32)  # (BT, 2D)
    # Precompute (1 + scale) and cast both rows to the x dtype (halves their DMA).
    shift = mod[:, :D].astype(x_BTHWD.dtype).reshape(BT, 1, D)
    gain = (1.0 + mod[:, D:]).astype(x_BTHWD.dtype).reshape(BT, 1, D)

    budget = _vmem_budget_bytes()
    TH = _choose_row_tile(HW, D, O, x_f.dtype.itemsize, x_f.dtype.itemsize,
                          budget, max_row_tile)
    if TH is None:
        # Degenerate HW: no multiple-of-128 divisor.  Avoid masked stores / a
        # VMEM-blowing full-HW block; let XLA handle it.
        return _final_layer_xla(x_f, shift, gain, w_lin_D_O, (B, T, H, W, O))

    grid = (BT, HW // TH)
    cparams = pltpu.CompilerParams(
        dimension_semantics=("parallel", "parallel"),
        vmem_limit_bytes=budget)

    if O % 128 == 0:
        # Output already lane-dense: write (1, TH, O) blocks in final layout,
        # no wrapper transpose needed.
        out = pl.pallas_call(
            final_layer_kernel_n,
            out_shape=jax.ShapeDtypeStruct((BT, HW, O), x_BTHWD.dtype),
            grid=grid,
            in_specs=[
                pl.BlockSpec((1, 1, D), lambda i, j: (i, 0, 0)),   # shift row
                pl.BlockSpec((1, 1, D), lambda i, j: (i, 0, 0)),   # (1+scale) row
                pl.BlockSpec((1, TH, D), lambda i, j: (i, j, 0)),  # x tile
                pl.BlockSpec((D, O), lambda i, j: (0, 0)),         # weight (grid const)
            ],
            out_specs=pl.BlockSpec((1, TH, O), lambda i, j: (i, j, 0)),
            compiler_params=cparams,
        )(shift, gain, x_f, w_lin_D_O)
        return out.reshape(B, T, H, W, O)

    # Small O (< 128): transposed projection so the stored last dim is TH
    # (multiple of 128 -> unmasked stores).  w_lin_t is torch's native (out, in).
    w_lin_t = w_lin_D_O.T
    out_t = pl.pallas_call(
        final_layer_kernel_t,
        out_shape=jax.ShapeDtypeStruct((BT, O, HW), x_BTHWD.dtype),
        grid=grid,
        in_specs=[
            pl.BlockSpec((1, 1, D), lambda i, j: (i, 0, 0)),       # shift row
            pl.BlockSpec((1, 1, D), lambda i, j: (i, 0, 0)),       # (1+scale) row
            pl.BlockSpec((1, TH, D), lambda i, j: (i, j, 0)),      # x tile
            pl.BlockSpec((O, D), lambda i, j: (0, 0)),             # weight (grid const)
        ],
        out_specs=pl.BlockSpec((1, O, TH), lambda i, j: (i, 0, j)),
        compiler_params=cparams,
    )(shift, gain, x_f, w_lin_t)

    # (BT, O, HW) -> (B, T, H, W, O).  Touches only O-minor data; fuses into the
    # consumer reshape (downstream unpatchify can also consume (BT, O, HW) directly).
    return jnp.swapaxes(out_t, 1, 2).reshape(B, T, H, W, O)


# --------------------------------------------------------------------------- #
# Pure-JAX reference (mirrors the PyTorch forward and the kernel's dtype policy)
# --------------------------------------------------------------------------- #
def final_layer_ref(x, emb, w_mod, w_lin):
    D = x.shape[-1]
    e = emb.astype(jnp.float32)
    e_silu = (e * jax.nn.sigmoid(e)).astype(w_mod.dtype)
    mod = jnp.dot(e_silu, w_mod, preferred_element_type=jnp.float32)
    shift = mod[..., :D].astype(x.dtype).astype(jnp.float32)
    gain = (1.0 + mod[..., D:]).astype(x.dtype).astype(jnp.float32)
    xf = x.astype(jnp.float32)
    mean = xf.mean(-1, keepdims=True)
    var = ((xf - mean) ** 2).mean(-1, keepdims=True)
    xn = (xf - mean) * jax.lax.rsqrt(var + _LN_EPS)
    xm = xn * gain[:, :, None, None, :] + shift[:, :, None, None, :]
    out = jnp.dot(xm.astype(w_lin.dtype), w_lin, preferred_element_type=jnp.float32)
    return out.astype(x.dtype)


if __name__ == "__main__":
    # Small shapes consistent with the module.
    B, T, H, W = 2, 2, 16, 16
    hidden_size = 32
    spatial_patch_size = 2
    temporal_patch_size = 1
    out_channels = 4
    O = spatial_patch_size * spatial_patch_size * temporal_patch_size * out_channels  # 16

    key = jax.random.PRNGKey(0)
    kx, ke, kwm, kwl = jax.random.split(key, 4)

    # bf16 end-to-end at the kernel boundary; LN/modulate math is f32 in-kernel.
    x = jax.random.normal(kx, (B, T, H, W, hidden_size), dtype=jnp.float32).astype(jnp.bfloat16)
    emb = jax.random.normal(ke, (B, T, hidden_size), dtype=jnp.float32).astype(jnp.bfloat16)
    # Weights stored (in, out), i.e. transposed vs torch's (out, in); bias=False.
    w_mod = (jax.random.normal(kwm, (hidden_size, 2 * hidden_size), dtype=jnp.float32)
             * (1.0 / jnp.sqrt(hidden_size))).astype(jnp.bfloat16)
    w_lin = (jax.random.normal(kwl, (hidden_size, O), dtype=jnp.float32)
             * (1.0 / jnp.sqrt(hidden_size))).astype(jnp.bfloat16)

    # max_row_tile=128 exercises HW tiling at demo size (grid = (B*T, HW/128) = (4, 2)).
    out = final_layer(x, emb, w_mod, w_lin, max_row_tile=128)
    out = jax.block_until_ready(out)

    ref = final_layer_ref(x, emb, w_mod, w_lin)
    assert out.shape == (B, T, H, W, O), out.shape
    err = float(jnp.max(jnp.abs(out.astype(jnp.float32) - ref.astype(jnp.float32))))
    # bf16 output => tolerance covers rounding differences between MXU and XLA paths.
    assert jnp.allclose(out.astype(jnp.float32), ref.astype(jnp.float32),
                        rtol=5e-2, atol=5e-2), err

    print("KERNEL_OK")
</pallas_src>

<mosaic_0001>
module attributes {stable_mosaic.version = 11 : i64} {
  func.func @final_layer_kernel_t(%arg0: i32, %arg1: i32, %arg2: memref<1x1x32xbf16, #tpu.memory_space<vmem>>, %arg3: memref<1x1x32xbf16, #tpu.memory_space<vmem>>, %arg4: memref<1x128x32xbf16, #tpu.memory_space<vmem>>, %arg5: memref<16x32xbf16, #tpu.memory_space<vmem>>, %arg6: memref<1x16x128xbf16, #tpu.memory_space<vmem>>) attributes {dimension_semantics = [#tpu.dimension_semantics<parallel>, #tpu.dimension_semantics<parallel>], iteration_bounds = array<i64: 4, 2>, scalar_prefetch = 0 : i64, scratch_operands = 0 : i64, tpu.core_type = #tpu.core_type<tc>, window_params = [{transform_indices = @transform_0, window_bounds = array<i64: 1, 1, 32>}, {transform_indices = @transform_1, window_bounds = array<i64: 1, 1, 32>}, {transform_indices = @transform_2, window_bounds = array<i64: 1, 128, 32>}, {pipeline_mode = #tpu.pipeline_mode<synchronous>, transform_indices = @transform_3, window_bounds = array<i64: 16, 32>}, {transform_indices = @transform_4, window_bounds = array<i64: 1, 16, 128>}]} {
    %c0 = arith.constant 0 : index
    %c0_0 = arith.constant 0 : index
    %c0_1 = arith.constant 0 : index
    %0 = vector.load %arg4[%c0, %c0_0, %c0_1] : memref<1x128x32xbf16, #tpu.memory_space<vmem>>, vector<1x128x32xbf16>
    %1 = vector.shape_cast %0 : vector<1x128x32xbf16> to vector<128x32xbf16>
    %2 = arith.extf %1 : vector<128x32xbf16> to vector<128x32xf32>
    %cst = arith.constant dense<0.000000e+00> : vector<128xf32>
    %3 = vector.multi_reduction <add>, %2, %cst [1] : vector<128x32xf32> to vector<128xf32>
    %4 = vector.shape_cast %3 : vector<128xf32> to vector<128x1xf32>
    %cst_2 = arith.constant 3.125000e-02 : f32
    %5 = vector.broadcast %cst_2 : f32 to vector<128x1xf32>
    %6 = arith.mulf %4, %5 : vector<128x1xf32>
    %7 = arith.mulf %2, %2 : vector<128x32xf32>
    %cst_3 = arith.constant dense<0.000000e+00> : vector<128xf32>
    %8 = vector.multi_reduction <add>, %7, %cst_3 [1] : vector<128x32xf32> to vector<128xf32>
    %9 = vector.shape_cast %8 : vector<128xf32> to vector<128x1xf32>
    %cst_4 = arith.constant 3.125000e-02 : f32
    %10 = vector.broadcast %cst_4 : f32 to vector<128x1xf32>
    %11 = arith.mulf %9, %10 : vector<128x1xf32>
    %12 = arith.mulf %6, %6 : vector<128x1xf32>
    %13 = arith.subf %11, %12 : vector<128x1xf32>
    %cst_5 = arith.constant 9.99999997E-7 : f32
    %14 = vector.broadcast %cst_5 : f32 to vector<128x1xf32>
    %15 = arith.addf %13, %14 : vector<128x1xf32>
    %16 = math.rsqrt %15 : vector<128x1xf32>
    %c0_6 = arith.constant 0 : index
    %c0_7 = arith.constant 0 : index
    %c0_8 = arith.constant 0 : index
    %17 = vector.load %arg3[%c0_6, %c0_7, %c0_8] : memref<1x1x32xbf16, #tpu.memory_space<vmem>>, vector<1x1x32xbf16>
    %18 = vector.shape_cast %17 : vector<1x1x32xbf16> to vector<1x32xbf16>
    %19 = arith.extf %18 : vector<1x32xbf16> to vector<1x32xf32>
    %c0_9 = arith.constant 0 : index
    %c0_10 = arith.constant 0 : index
    %c0_11 = arith.constant 0 : index
    %20 = vector.load %arg2[%c0_9, %c0_10, %c0_11] : memref<1x1x32xbf16, #tpu.memory_space<vmem>>, vector<1x1x32xbf16>
    %21 = vector.shape_cast %20 : vector<1x1x32xbf16> to vector<1x32xbf16>
    %22 = arith.extf %21 : vector<1x32xbf16> to vector<1x32xf32>
    %23 = vector.broadcast %6 : vector<128x1xf32> to vector<128x32xf32>
    %24 = arith.subf %2, %23 : vector<128x32xf32>
    %25 = vector.broadcast %16 : vector<128x1xf32> to vector<128x32xf32>
    %26 = arith.mulf %24, %25 : vector<128x32xf32>
    %27 = vector.broadcast %19 : vector<1x32xf32> to vector<128x32xf32>
    %28 = arith.mulf %26, %27 : vector<128x32xf32>
    %29 = vector.broadcast %22 : vector<1x32xf32> to vector<128x32xf32>
    %30 = arith.addf %28, %29 : vector<128x32xf32>
    %31 = arith.truncf %30 : vector<128x32xf32> to vector<128x32xbf16>
    %c0_12 = arith.constant 0 : index
    %c0_13 = arith.constant 0 : index
    %32 = vector.load %arg5[%c0_12, %c0_13] : memref<16x32xbf16, #tpu.memory_space<vmem>>, vector<16x32xbf16>
    %cst_14 = arith.constant dense<0.000000e+00> : vector<16x128xf32>
    %33 = tpu.matmul %32, %31, %cst_14 {dimension_numbers = #tpu.dot_dimension_numbers<[1], [1], [0], [0], [0, 0, 1, 0], [], []>} : vector<16x32xbf16>, vector<128x32xbf16>, vector<16x128xf32> -> vector<16x128xf32>
    %34 = arith.truncf %33 : vector<16x128xf32> to vector<16x128xbf16>
    %c0_15 = arith.constant 0 : index
    %c0_16 = arith.constant 0 : index
    %c0_17 = arith.constant 0 : index
    %35 = vector.load %arg6[%c0_15, %c0_16, %c0_17] : memref<1x16x128xbf16, #tpu.memory_space<vmem>>, vector<1x16x128xbf16>
    %36 = vector.shape_cast %35 : vector<1x16x128xbf16> to vector<16x128xbf16>
    %37 = vector.shape_cast %34 : vector<16x128xbf16> to vector<1x16x128xbf16>
    tpu.vector_store %arg6[%c0_15, %c0_16, %c0_17], %37 {strides = array<i32>} : memref<1x16x128xbf16, #tpu.memory_space<vmem>>, vector<1x16x128xbf16>,
    return
  }
  func.func @transform_0(%arg0: i32, %arg1: i32) -> (i32, i32, i32) {
    %c0_i32 = arith.constant 0 : i32
    %c0_i32_0 = arith.constant 0 : i32
    %c0_i32_1 = arith.constant 0 : i32
    return %arg0, %c0_i32, %c0_i32_0 : i32, i32, i32
  }
  func.func @transform_1(%arg0: i32, %arg1: i32) -> (i32, i32, i32) {
    %c0_i32 = arith.constant 0 : i32
    %c0_i32_0 = arith.constant 0 : i32
    %c0_i32_1 = arith.constant 0 : i32
    return %arg0, %c0_i32, %c0_i32_0 : i32, i32, i32
  }
  func.func @transform_2(%arg0: i32, %arg1: i32) -> (i32, i32, i32) {
    %c0_i32 = arith.constant 0 : i32
    %c0_i32_0 = arith.constant 0 : i32
    return %arg0, %arg1, %c0_i32 : i32, i32, i32
  }
  func.func @transform_3(%arg0: i32, %arg1: i32) -> (i32, i32) {
    %c0_i32 = arith.constant 0 : i32
    %c0_i32_0 = arith.constant 0 : i32
    %c0_i32_1 = arith.constant 0 : i32
    return %c0_i32, %c0_i32_0 : i32, i32
  }
  func.func @transform_4(%arg0: i32, %arg1: i32) -> (i32, i32, i32) {
    %c0_i32 = arith.constant 0 : i32
    %c0_i32_0 = arith.constant 0 : i32
    return %arg0, %c0_i32, %arg1 : i32, i32, i32
  }
}

</mosaic_0001>

<bundles_post_ra>
// kernel: tpu_custom_call.1
= control target key start
LH: loop header
LB: loop body
LE: loop exit
PB: predicated region body
PF: predicated region fallthrough
CT: control target
= control target key end

     0   :  { %9 = vsyncpa [#allocation3], 0  ;;  %s1513_s0 = inlined_call_operand.vmem [shape: bf16[4,1,32], index: 0, kind: input, shape index: {}]   ;;  %s1514_s1 = inlined_call_operand.vmem [shape: bf16[4,1,32], index: 1, kind: input, shape index: {}]   ;;  %s1515_s2 = inlined_call_operand.vmem [shape: bf16[4,256,32], index: 2, kind: input, shape index: {}]   ;;  %s1516_s3 = inlined_call_operand.vmem [shape: bf16[16,32], index: 3, kind: input, shape index: {}]   ;;  %s1517_s4 = inlined_call_operand.hbm [shape: bf16[4,16,256], index: 4, kind: output, shape index: {}]  }
   0x1   :  { %11 = vsyncpa [#allocation3 + $0x1], 0  ;;  %s1108_s15 = smov 0   ;;  %s1110_s16 = smov 0  }
   0x2   :  { %s1112_s17 = smov 0   ;;  %s1114_s18 = smov 0  }
   0x3   :  { %s1116_s19 = smov 0   ;;  %s1118_s20 = smov 0  }
   0x4   :  { %s1120_s21 = smov 0   ;;  %s1122_s22 = smov 0  }
   0x5 LB: > { %s779_s23 = sadd.s32 4294967295, %s1075_s22   ;;  %s780_s24 = sadd.s32 4294967294, %s1075_s22   ;;  %s1075_s22 = sphi %s1122_s22, %s17_s22   ;;  %s1071_s21 = sphi %s1120_s21, %s1526_s21   ;;  %s1067_s20 = sphi %s1118_s20, %s1525_s20   ;;  %s1063_s19 = sphi %s1116_s19, %s1524_s19   ;;  %s1059_s18 = sphi %s1114_s18, %s1523_s18   ;;  %s1055_s17 = sphi %s1112_s17, %s1522_s17   ;;  %s1051_s16 = sphi %s1110_s16, %s1521_s16   ;;  %s1047_s15 = sphi %s1108_s15, %s1520_s15  }
   0x6   : > { %s26_s25 = sadd.s32 1, %s1067_s20  ;;  %s29_s26 = sadd.s32 1, %s1071_s21 }
   0x7   : > { %p27_p0 = scmp.ge.s32.totalorder %s26_s25, 2  ;;  %p149_p1 = scmp.ne.s32.totalorder %s1055_s17, %s1051_s16 }
   0x8   : > { %p150_p2 = scmp.eq.s32.totalorder %s779_s23, 7  ;;  %p155_p5 = scmp.ne.s32.totalorder %s1051_s16, %s1047_s15 }
   0x9   : > { %s1528_s25 = smov (%p27_p0, %s26_s25), 0  ;;  %s1530_s26 = smov (!%p27_p0, %s29_s26), %s1071_s21 }
   0xa   : > { %s135_s27 = ssub.s32 %s1067_s20, %s1528_s25  ;;  %p1159_p3 = por %p150_p2, %p149_p1 }
   0xb   : > { %p31_p4 = scmp.ge.s32.totalorder %s1530_s26, 4  ;;  %p156_p6 = scmp.eq.s32.totalorder %s780_s24, 7 }
   0xc   : > { %p783_p7 = scmp.ge.s32.totalorder %s1075_s22, 1  ;;  %p202_p9 = scmp.lt.s32.totalorder %s1075_s22, 9 }
   0xd   : > { %s1532_s26 = smov (%p31_p4, %s1530_s26), 0  ;;  %p1168_p8 = por %p156_p6, %p155_p5 }
   0xe   : > { %s134_s30 = ssub.s32 %s1071_s21, %s1532_s26  ;;  %s139_s5 = sadd.s32 1, %s1055_s17 }
   0xf   : > { %s136_s6 = sor.u32 %s135_s27, %s134_s30  ;;  %p203_p10 = pnand %p783_p7, %p202_p9 }
  0x10   : > { %p137_p11 = scmp.eq.s32.totalorder %s136_s6, 0  ;;  %p238_p12 = scmp.lt.s32.totalorder (!%p203_p10), %s1063_s19, 3  ;;  %vm287_vm0 = vcmask (!%p203_p10), 261120   ;;  %v1077_v60 = vmov (!%p203_p10), 0.0   ;;  %vm1078_vm1 = vmmov (!%p203_p10), 0  }
  0x11   : > { %206 = sbr.rel (%p203_p10) target bundleno = 503 (0x1f7), region = 36  ;;  %s785_s8 = sshll.u32 (!%p203_p10), %s1059_s18, 4  ;;  %852 = vmatprep.subr.bf16.mxu0 (!%p203_p10), %v1077_v60  ;;  %868 = vmatprep.mubr.msk.bf16.mxu0 (!%p203_p10), %vm1078_vm1, %v1077_v60 }
  0x12   : > { %s1177_s7 = scalar_select %p137_p11, %s1055_s17, %s139_s5  }
  0x13   : > { %p247_p13 = scmp.lt.s32.totalorder (!%p203_p10), %s785_s8, 31  ;;  %s793_s13 = sshll.u32 (!%p203_p10), %s1063_s19, 2 }
  0x14   : > { %s677_s14 = sadd.s32 (!%p203_p10), %s1059_s18, %s793_s13 }
  0x15   : > { %s794_s27 = sshll.u32 (!%p203_p10), %s677_s14, 6 }
  0x16   : > { %s1459_s6 = scalar_lea.hbm (!%p203_p10), %s1517_s4, %s794_s27 }
  0x18   : > { %s1182_s9 = scalar_select %p238_p12, %s1063_s19, 3 }
  0x19   : > { %s1534_s8 = smov (!%p247_p13, %s785_s8), 31 }
  0x1a   : > { %s786_s10 = sshll.u32 %s1182_s9, 5  ;;  %s243_s30 = scalar_lea.vmem %s1514_s1, %s1182_s9 }
  0x1b   : > { %s250_s11 = sadd.s32 %s786_s10, %s1534_s8  ;;  %s240_s8 = scalar_lea.vmem %s1513_s0, %s1182_s9 }
  0x1c   : > { %s787_s12 = sshll.u32 %s250_s11, 2  ;;  %s235_s11 = sand.u32 1, %s1051_s16  }
  0x1d   : > { %s1188_s23 = scalar_lea.vmem %s1515_s2, %s787_s12  ;;  %s784_s12 = sshll.u32 %s235_s11, 3 }
  0x1e   : > { %v800_v0 = vld [vmem:[%s1188_s23] sm:$0xff]   ;;  %v836_v3 = vld [vmem:[%s1188_s23 + $0x8] sm:$0xff]   ;;  %v837_v14 = vld [vmem:[%s1188_s23 + $0x10] sm:$0xff]   ;;  %s1461_s18 = scalar_lea.sflag [#allocation3], %s235_s11 }
  0x1f   : > { %v1191_v1 = vunpack.c.l.bf16 %v800_v0  ;;  %v1193_v2 = vunpack.c.h.bf16 %v800_v0  ;;  %v1205_v9 = vunpack.c.l.bf16 %v836_v3  ;;  %v1208_v11 = vunpack.c.h.bf16 %v836_v3  ;;  %v838_v23 = vld [vmem:[%s1188_s23 + $0x18] sm:$0xff]   ;;  %v839_v32 = vld [vmem:[%s1188_s23 + $0x20] sm:$0xff]   ;;  %v840_v41 = vld [vmem:[%s1188_s23 + $0x28] sm:$0xff]  }
  0x20   : > { %v1220_v18 = vunpack.c.l.bf16 %v837_v14  ;;  %v1223_v20 = vunpack.c.h.bf16 %v837_v14  ;;  %v1235_v27 = vunpack.c.l.bf16 %v838_v23  ;;  %v1238_v29 = vunpack.c.h.bf16 %v838_v23  ;;  %v841_v50 = vld [vmem:[%s1188_s23 + $0x30] sm:$0xff]   ;;  %v842_v59 = vld [vmem:[%s1188_s23 + $0x38] sm:$0xff]   ;;  %s237_s23 = scalar_lea.vmem [#allocation2], %s784_s12 }
  0x21   : > { %v288_v4 = vsel %vm287_vm0, %v1191_v1, 0.0  ;;  %v352_v5 = vmul.f32 %v1191_v1, %v1191_v1  ;;  %v353_v6 = vmul.f32 %v1193_v2, %v1193_v2  ;;  %v291_v8 = vsel %vm287_vm0, %v1193_v2, 0.0  ;;  %s680_s24 = sshll.u32 %s237_s23, 4  ;;  %s1454_s24 = int_to_ptr.vmem [resolvable:$true] %s680_s24 }
  0x22   : > { %289 = vadd.xlane.f32.xlu0 %v288_v4  ;;  %v294_v12 = vsel %vm287_vm0, %v1205_v9, 0.0  ;;  %v354_v13 = vmul.f32 %v1205_v9, %v1205_v9  ;;  %v297_v15 = vsel %vm287_vm0, %v1208_v11, 0.0  ;;  %v355_v16 = vmul.f32 %v1208_v11, %v1208_v11  ;;  %s981_s19 = scalar_lea.vmem %s1454_s24, 128 }
  0x23   : > { %v368_v7 = vsel %vm287_vm0, %v352_v5, 0.0  ;;  %v371_v10 = vsel %vm287_vm0, %v353_v6, 0.0  ;;  %v300_v21 = vsel %vm287_vm0, %v1220_v18, 0.0  ;;  %v356_v22 = vmul.f32 %v1220_v18, %v1220_v18  ;;  %p982_p0 = scmp.ne.s32.totalorder %s1454_s24, %s981_s19 }
  0x24   : > { %369 = vadd.xlane.f32.xlu1 %v368_v7  ;;  %v374_v17 = vsel %vm287_vm0, %v354_v13, 0.0  ;;  %v377_v19 = vsel %vm287_vm0, %v355_v16, 0.0  ;;  %v303_v24 = vsel %vm287_vm0, %v1223_v20, 0.0  ;;  %v357_v25 = vmul.f32 %v1223_v20, %v1223_v20 }
  0x25   : > { %v380_v26 = vsel %vm287_vm0, %v356_v22, 0.0  ;;  %v306_v30 = vsel %vm287_vm0, %v1235_v27, 0.0  ;;  %v358_v31 = vmul.f32 %v1235_v27, %v1235_v27  ;;  %v309_v33 = vsel %vm287_vm0, %v1238_v29, 0.0  ;;  %p983_p1 = pnand %p982_p0, %p1159_p3 }
  0x26   : > { %292 = vadd.xlane.f32.xlu0 %v291_v8  ;;  %v383_v28 = vsel %vm287_vm0, %v357_v25, 0.0  ;;  %v359_v34 = vmul.f32 %v1238_v29, %v1238_v29  ;;  %v1250_v36 = vunpack.c.l.bf16 %v839_v32  ;;  %v1253_v38 = vunpack.c.h.bf16 %v839_v32 }
  0x27   : > { %v386_v35 = vsel %vm287_vm0, %v358_v31, 0.0  ;;  %v1265_v45 = vunpack.c.l.bf16 %v840_v41  ;;  %v1268_v47 = vunpack.c.h.bf16 %v840_v41  ;;  %v1280_v54 = vunpack.c.l.bf16 %v841_v50  ;;  %v496_v41 = vld [vmem:[%s243_s30] sm:$0x1]  ;;  %p984_p2 = pneg %p983_p1 }
  0x28   : > { %372 = vadd.xlane.f32.xlu1 %v371_v10  ;;  %v389_v37 = vsel %vm287_vm0, %v359_v34, 0.0  ;;  %v312_v39 = vsel %vm287_vm0, %v1250_v36, 0.0  ;;  %v360_v40 = vmul.f32 %v1250_v36, %v1250_v36  ;;  %v315_v42 = vsel %vm287_vm0, %v1253_v38, 0.0 }
  0x29   : > { %v361_v43 = vmul.f32 %v1253_v38, %v1253_v38  ;;  %v318_v48 = vsel %vm287_vm0, %v1265_v45, 0.0  ;;  %v362_v49 = vmul.f32 %v1265_v45, %v1265_v45  ;;  %v321_v51 = vsel %vm287_vm0, %v1268_v47, 0.0 }
  0x2a   : > { %295 = vadd.xlane.f32.xlu0 %v294_v12  ;;  %v392_v44 = vsel %vm287_vm0, %v360_v40, 0.0  ;;  %v363_v52 = vmul.f32 %v1268_v47, %v1268_v47  ;;  %v1283_v56 = vunpack.c.h.bf16 %v841_v50  ;;  %v324_v57 = vsel %vm287_vm0, %v1280_v54, 0.0 }
  0x2b   : > { %v395_v46 = vsel %vm287_vm0, %v361_v43, 0.0  ;;  %v398_v53 = vsel %vm287_vm0, %v362_v49, 0.0  ;;  %v364_v58 = vmul.f32 %v1280_v54, %v1280_v54  ;;  %v1296_v0 = vunpack.c.l.bf16 %v842_v59 }
  0x2c   : > { %298 = vadd.xlane.f32.xlu1 %v297_v15  ;;  %v401_v55 = vsel %vm287_vm0, %v363_v52, 0.0  ;;  %v327_v61 = vsel %vm287_vm0, %v1283_v56, 0.0  ;;  %v365_v62 = vmul.f32 %v1283_v56, %v1283_v56  ;;  %v1299_v4 = vunpack.c.h.bf16 %v842_v59  ;;  %v498_v52 = vld [vmem:[%s240_s8] sm:$0x1]  ;;  %s1079_s8 = smov [#allocation2]  }
  0x2d   : > { %v404_v63 = vsel %vm287_vm0, %v364_v58, 0.0  ;;  %v330_v5 = vsel %vm287_vm0, %v1296_v0, 0.0  ;;  %v366_v6 = vmul.f32 %v1296_v0, %v1296_v0  ;;  %v497_v50 = vunpack.c.l.bf16 %v496_v41  ;;  %s985_s9 = sshll.u32 %s1079_s8, 4  ;;  %s986_s9 = int_to_ptr.vmem [resolvable:$false] %s985_s9 }
  0x2e   : > { %375 = vadd.xlane.f32.xlu0 %v374_v17  ;;  %v407_v3 = vsel %vm287_vm0, %v365_v62, 0.0  ;;  %v333_v7 = vsel %vm287_vm0, %v1299_v4, 0.0  ;;  %v367_v8 = vmul.f32 %v1299_v4, %v1299_v4  ;;  %s987_s10 = scalar_lea.vmem %s986_s9, 256  ;;  %p988_p4 = scmp.lt.s32.totalorder %s1454_s24, %s986_s9 }
  0x2f   : > { %v410_v10 = vsel %vm287_vm0, %v366_v6, 0.0  ;;  %p989_p5 = scmp.lt.s32.totalorder %s987_s10, %s981_s19 }
  0x30   : > { %378 = vadd.xlane.f32.xlu1 %v377_v19  ;;  %v413_v12 = vsel %vm287_vm0, %v367_v8, 0.0 }
  0x31   : > { %p990_p6 = por %p989_p5, %p988_p4 }
  0x32   : > { %301 = vadd.xlane.f32.xlu0 %v300_v21 }
  0x33   : > { %p991_p7 = pnand %p990_p6, %p984_p2 }
  0x34   : > { %304 = vadd.xlane.f32.xlu1 %v303_v24 }
  0x36   : > { %381 = vadd.xlane.f32.xlu0 %v380_v26 }
  0x38   : > { %384 = vadd.xlane.f32.xlu1 %v383_v28  ;;  %v532_v28 = vlaneseq }
  0x3a   : > { %307 = vadd.xlane.f32.xlu0 %v306_v30 }
  0x3c   : > { %310 = vadd.xlane.f32.xlu1 %v309_v33 }
  0x3e   : > { %387 = vadd.xlane.f32.xlu0 %v386_v35 }
  0x40   : > { %390 = vadd.xlane.f32.xlu1 %v389_v37 }
  0x42   : > { %313 = vadd.xlane.f32.xlu0 %v312_v39  ;;  %v533_v39 = vshrl.u32 %v532_v28, 7 }
  0x44   : > { %316 = vadd.xlane.f32.xlu1 %v315_v42  ;;  %v534_v49 = vsub.s32 0, %v533_v39 }
  0x46   : > { %393 = vadd.xlane.f32.xlu0 %v392_v44 }
  0x48   : > { %396 = vadd.xlane.f32.xlu1 %v395_v46 }
  0x4a   : > { %319 = vadd.xlane.f32.xlu0 %v318_v48 }
  0x4c   : > { %322 = vadd.xlane.f32.xlu1 %v321_v51 }
  0x4e   : > { %399 = vadd.xlane.f32.xlu0 %v398_v53 }
  0x50   : > { %402 = vadd.xlane.f32.xlu1 %v401_v55 }
  0x52   : > { %325 = vadd.xlane.f32.xlu0 %v324_v57 }
  0x54   : > { %328 = vadd.xlane.f32.xlu1 %v327_v61 }
  0x56   : > { %405 = vadd.xlane.f32.xlu0 %v404_v63 }
  0x58   : > { %408 = vadd.xlane.f32.xlu1 %v407_v3  ;;  %v499_v3 = vunpack.c.l.bf16 %v498_v52 }
  0x5a   : > { %331 = vadd.xlane.f32.xlu0 %v330_v5  ;;  %v1333_v5 = vrot.slane %v497_v50, %v534_v49 }
  0x5c   : > { %334 = vadd.xlane.f32.xlu1 %v333_v7 }
  0x5e   : > { %411 = vadd.xlane.f32.xlu0 %v410_v10 }
  0x60   : > { %414 = vadd.xlane.f32.xlu1 %v413_v12 }
  0xaf   : > { %v290_v13 = vpop.xlane.xlu0 %289 }
  0xb0   : > { %v336_v14 = vmul.f32 0.03125, %v290_v13 }
  0xb1   : > { %v370_v15 = vpop.xlane.xlu1 %369 }
  0xb2   : > { %v432_v16 = vmul.f32 %v336_v14, %v336_v14  ;;  %v416_v17 = vmul.f32 0.03125, %v370_v15  ;;  %v500_v58 = vsub.f32 %v1191_v1, %v336_v14 }
  0xb3   : > { %v293_v19 = vpop.xlane.xlu0 %292 }
  0xb4   : > { %v448_v21 = vsub.f32 %v416_v17, %v432_v16  ;;  %v337_v22 = vmul.f32 0.03125, %v293_v19  ;;  %v1340_v17 = vrot.slane %v499_v3, %v534_v49 }
  0xb5   : > { %v373_v23 = vpop.xlane.xlu1 %372 }
  0xb6   : > { %v464_v24 = vadd.f32 1e-06, %v448_v21  ;;  %v433_v25 = vmul.f32 %v337_v22, %v337_v22  ;;  %v417_v26 = vmul.f32 0.03125, %v373_v23  ;;  %v501_v12 = vsub.f32 %v1193_v2, %v337_v22 }
  0xb7   : > { %v296_v30 = vpop.xlane.xlu0 %295 }
  0xb8   : > { %949 = vrsqrt.f32 %v464_v24  ;;  %v449_v31 = vsub.f32 %v417_v26, %v433_v25  ;;  %v1312_v32 = vmul.f32 0.03125, %v296_v30 }
  0xb9   : > { %v299_v33 = vpop.xlane.xlu1 %298 }
  0xba   : > { %v465_v34 = vadd.f32 1e-06, %v449_v31  ;;  %v434_v35 = vmul.f32 %v1312_v32, %v1312_v32  ;;  %v1320_v37 = vmul.f32 0.03125, %v299_v33  ;;  %v502_v31 = vsub.f32 %v1205_v9, %v1312_v32 }
  0xbb   : > { %v376_v40 = vpop.xlane.xlu0 %375 }
  0xbc   : > { %951 = vrsqrt.f32 %v465_v34  ;;  %v418_v42 = vmul.f32 0.03125, %v376_v40  ;;  %v435_v44 = vmul.f32 %v1320_v37, %v1320_v37 }
  0xbd   : > { %v379_v43 = vpop.xlane.xlu1 %378 }
  0xbe   : > { %v450_v46 = vsub.f32 %v418_v42, %v434_v35  ;;  %v419_v48 = vmul.f32 0.03125, %v379_v43  ;;  %v503_v42 = vsub.f32 %v1208_v11, %v1320_v37 }
  0xbf   : > { %v302_v51 = vpop.xlane.xlu0 %301 }
  0xc0   : > { %v466_v53 = vadd.f32 1e-06, %v450_v46  ;;  %v451_v55 = vsub.f32 %v419_v48, %v435_v44  ;;  %v1328_v57 = vmul.f32 0.03125, %v302_v51 }
  0xc1   : > { %v305_v59 = vpop.xlane.xlu1 %304 }
  0xc2   : > { %v950_v61 = vpop.eup %949  ;;  %953 = vrsqrt.f32 %v466_v53  ;;  %v467_v62 = vadd.f32 1e-06, %v451_v55  ;;  %v436_v63 = vmul.f32 %v1328_v57, %v1328_v57  ;;  %v1335_v6 = vmul.f32 0.03125, %v305_v59 }
  0xc3   : > { %v382_v7 = vpop.xlane.xlu0 %381  ;;  %v516_v8 = vmul.f32 %v950_v61, %v500_v58 }
  0xc4   : > { %955 = vrsqrt.f32 %v467_v62  ;;  %v420_v10 = vmul.f32 0.03125, %v382_v7  ;;  %v437_v14 = vmul.f32 %v1335_v6, %v1335_v6 }
  0xc5   : > { %v385_v13 = vpop.xlane.xlu1 %384  ;;  %v536_v23 = vmul.f32 %v1333_v5, %v516_v8 }
  0xc6   : > { %v952_v1 = vpop.eup %951  ;;  %v452_v15 = vsub.f32 %v420_v10, %v436_v63  ;;  %v421_v16 = vmul.f32 0.03125, %v385_v13  ;;  %v504_v63 = vsub.f32 %v1220_v18, %v1328_v57 }
  0xc7   : > { %v308_v19 = vpop.xlane.xlu0 %307  ;;  %v517_v21 = vmul.f32 %v952_v1, %v501_v12  ;;  %v556_v35 = vadd.f32 %v1340_v17, %v536_v23  ;;  %v505_v1 = vsub.f32 %v1223_v20, %v1335_v6 }
  0xc8   : > { %v468_v24 = vadd.f32 1e-06, %v452_v15  ;;  %v453_v25 = vsub.f32 %v421_v16, %v437_v14  ;;  %v1343_v26 = vmul.f32 0.03125, %v308_v19 }
  0xc9   : > { %v311_v28 = vpop.xlane.xlu1 %310  ;;  %v537_v2 = vmul.f32 %v1333_v5, %v517_v21 }
  0xca   : > { %957 = vrsqrt.f32 %v468_v24  ;;  %v469_v22 = vadd.f32 1e-06, %v453_v25  ;;  %v438_v30 = vmul.f32 %v1343_v26, %v1343_v26  ;;  %v1350_v33 = vmul.f32 0.03125, %v311_v28 }
  0xcb   : > { %v388_v34 = vpop.xlane.xlu0 %387  ;;  %v557_v39 = vadd.f32 %v1340_v17, %v537_v2 }
  0xcc   : > { %v954_v40 = vpop.eup %953  ;;  %959 = vrsqrt.f32 %v469_v22  ;;  %v422_v41 = vmul.f32 0.03125, %v388_v34  ;;  %v439_v9 = vmul.f32 %v1350_v33, %v1350_v33 }
  0xcd   : > { %v391_v43 = vpop.xlane.xlu1 %390  ;;  %v572_v44 = vpack.c.bf16 %v557_v39, %v556_v35  ;;  %v518_v46 = vmul.f32 %v954_v40, %v502_v31  ;;  %v506_v35 = vsub.f32 %v1235_v27, %v1343_v26 }
  0xce   : > { %v956_v48 = vpop.eup %955  ;;  %v454_v32 = vsub.f32 %v422_v41, %v438_v30  ;;  %v423_v49 = vmul.f32 0.03125, %v391_v43 }
  0xcf   : > { %v314_v50 = vpop.xlane.xlu0 %313  ;;  %v591_v51 = vsel %vm287_vm0, %v572_v44, 0  ;;  %v519_v52 = vmul.f32 %v956_v48, %v503_v42  ;;  %v538_v53 = vmul.f32 %v1333_v5, %v518_v46  ;;  %v507_v46 = vsub.f32 %v1238_v29, %v1350_v33 }
  0xd0   : > { %v470_v55 = vadd.f32 1e-06, %v454_v32  ;;  %v455_v58 = vsub.f32 %v423_v49, %v439_v9  ;;  %v1360_v59 = vmul.f32 0.03125, %v314_v50  ;;  %853 = vmatpush3.bf16.xpose.msra.mxu0 %v591_v51 }
  0xd1   : > { %v317_v11 = vpop.xlane.xlu1 %316  ;;  %854 = vmatprep.subr.bf16.mxu0 %v1077_v60  ;;  %v539_v37 = vmul.f32 %v1333_v5, %v519_v52  ;;  %v558_v8 = vadd.f32 %v1340_v17, %v538_v53 }
  0xd2   : > { %961 = vrsqrt.f32 %v470_v55  ;;  %v471_v61 = vadd.f32 1e-06, %v455_v58  ;;  %v440_v62 = vmul.f32 %v1360_v59, %v1360_v59  ;;  %v1368_v3 = vmul.f32 0.03125, %v317_v11 }
  0xd3   : > { %v394_v7 = vpop.xlane.xlu0 %393  ;;  %v559_v10 = vadd.f32 %v1340_v17, %v539_v37 }
  0xd4   : > { %v958_v12 = vpop.eup %957  ;;  %963 = vrsqrt.f32 %v471_v61  ;;  %v424_v13 = vmul.f32 0.03125, %v394_v7  ;;  %v441_v18 = vmul.f32 %v1368_v3, %v1368_v3 }
  0xd5   : > { %v397_v14 = vpop.xlane.xlu1 %396  ;;  %v573_v15 = vpack.c.bf16 %v559_v10, %v558_v8  ;;  %v520_v16 = vmul.f32 %v958_v12, %v504_v63  ;;  %v508_v63 = vsub.f32 %v1250_v36, %v1360_v59 }
  0xd6   : > { %v960_v19 = vpop.eup %959  ;;  %v456_v57 = vsub.f32 %v424_v13, %v440_v62  ;;  %v425_v21 = vmul.f32 0.03125, %v397_v14  ;;  %v509_v14 = vsub.f32 %v1253_v38, %v1368_v3 }
  0xd7   : > { %v320_v23 = vpop.xlane.xlu0 %319  ;;  %v594_v24 = vsel %vm287_vm0, %v573_v15, 0  ;;  %v521_v25 = vmul.f32 %v960_v19, %v505_v1  ;;  %v540_v28 = vmul.f32 %v1333_v5, %v520_v16 }
  0xd8   : > { %v472_v2 = vadd.f32 1e-06, %v456_v57  ;;  %v457_v22 = vsub.f32 %v425_v21, %v441_v18  ;;  %v1378_v30 = vmul.f32 0.03125, %v320_v23  ;;  %855 = vmatpush3.bf16.xpose.msra.mxu0 %v594_v24 }
  0xd9   : > { %v323_v20 = vpop.xlane.xlu1 %322  ;;  %856 = vmatprep.subr.bf16.mxu0 %v1077_v60  ;;  %v541_v6 = vmul.f32 %v1333_v5, %v521_v25  ;;  %v560_v41 = vadd.f32 %v1340_v17, %v540_v28 }
  0xda   : > { %965 = vrsqrt.f32 %v472_v2  ;;  %v473_v31 = vadd.f32 1e-06, %v457_v22  ;;  %v442_v34 = vmul.f32 %v1378_v30, %v1378_v30  ;;  %v1386_v39 = vmul.f32 0.03125, %v323_v20 }
  0xdb   : > { %v400_v40 = vpop.xlane.xlu0 %399  ;;  %v561_v42 = vadd.f32 %v1340_v17, %v541_v6 }
  0xdc   : > { %v962_v43 = vpop.eup %961  ;;  %967 = vrsqrt.f32 %v473_v31  ;;  %v426_v44 = vmul.f32 0.03125, %v400_v40  ;;  %v443_v27 = vmul.f32 %v1386_v39, %v1386_v39  ;;  %v510_v31 = vsub.f32 %v1265_v45, %v1378_v30 }
  0xdd   : > { %v403_v48 = vpop.xlane.xlu1 %402  ;;  %v574_v9 = vpack.c.bf16 %v561_v42, %v560_v41  ;;  %v522_v32 = vmul.f32 %v962_v43, %v506_v35 }
  0xde   : > { %v964_v49 = vpop.eup %963  ;;  %v458_v26 = vsub.f32 %v426_v44, %v442_v34  ;;  %v427_v50 = vmul.f32 0.03125, %v403_v48  ;;  %v511_v44 = vsub.f32 %v1268_v47, %v1386_v39 }
  0xdf   : > { %v326_v51 = vpop.xlane.xlu0 %325  ;;  %v597_v52 = vsel %vm287_vm0, %v574_v9, 0  ;;  %v523_v53 = vmul.f32 %v964_v49, %v507_v46  ;;  %v542_v55 = vmul.f32 %v1333_v5, %v522_v32 }
  0xe0   : > { %v474_v58 = vadd.f32 1e-06, %v458_v26  ;;  %v459_v11 = vsub.f32 %v427_v50, %v443_v27  ;;  %v1396_v37 = vmul.f32 0.03125, %v326_v51  ;;  %857 = vmatpush3.bf16.xpose.msra.mxu0 %v597_v52 }
  0xe1   : > { %v329_v29 = vpop.xlane.xlu1 %328  ;;  %858 = vmatprep.subr.bf16.mxu0 %v1077_v60  ;;  %v543_v33 = vmul.f32 %v1333_v5, %v523_v53  ;;  %v562_v10 = vadd.f32 %v1340_v17, %v542_v55 }
  0xe2   : > { %969 = vrsqrt.f32 %v474_v58  ;;  %v475_v61 = vadd.f32 1e-06, %v459_v11  ;;  %v444_v62 = vmul.f32 %v1396_v37, %v1396_v37  ;;  %v1404_v7 = vmul.f32 0.03125, %v329_v29 }
  0xe3   : > { %v406_v8 = vpop.xlane.xlu0 %405  ;;  %v563_v12 = vadd.f32 %v1340_v17, %v543_v33  ;;  %v512_v39 = vsub.f32 %v1280_v54, %v1396_v37 }
  0xe4   : > { %v966_v13 = vpop.eup %965  ;;  %971 = vrsqrt.f32 %v475_v61  ;;  %v428_v1 = vmul.f32 0.03125, %v406_v8  ;;  %v445_v36 = vmul.f32 %v1404_v7, %v1404_v7  ;;  %v513_v29 = vsub.f32 %v1283_v56, %v1404_v7 }
  0xe5   : > { %v409_v15 = vpop.xlane.xlu1 %408  ;;  %v575_v16 = vpack.c.bf16 %v563_v12, %v562_v10  ;;  %v524_v19 = vmul.f32 %v966_v13, %v508_v63 }
  0xe6   : > { %v968_v18 = vpop.eup %967  ;;  %v460_v59 = vsub.f32 %v428_v1, %v444_v62  ;;  %v429_v57 = vmul.f32 0.03125, %v409_v15 }
  0xe7   : > { %v332_v21 = vpop.xlane.xlu0 %331  ;;  %v600_v23 = vsel %vm287_vm0, %v575_v16, 0  ;;  %v525_v24 = vmul.f32 %v968_v18, %v509_v14  ;;  %v544_v25 = vmul.f32 %v1333_v5, %v524_v19 }
  0xe8   : > { %v476_v28 = vadd.f32 1e-06, %v460_v59  ;;  %v461_v2 = vsub.f32 %v429_v57, %v445_v36  ;;  %v350_v22 = vmul.f32 0.03125, %v332_v21  ;;  %859 = vmatpush3.bf16.xpose.msra.mxu0 %v600_v23  ;;  %v948_v21 = vld [vmem:[%s1516_s3] sm:$0xff]  }
  0xe9   : > { %v335_v38 = vpop.xlane.xlu1 %334  ;;  %860 = vmatprep.subr.bf16.mxu0 %v1077_v60  ;;  %v545_v3 = vmul.f32 %v1333_v5, %v525_v24  ;;  %v564_v40 = vadd.f32 %v1340_v17, %v544_v25 }
  0xea   : > { %973 = vrsqrt.f32 %v476_v28  ;;  %v477_v20 = vadd.f32 1e-06, %v461_v2  ;;  %v446_v6 = vmul.f32 %v350_v22, %v350_v22  ;;  %v351_v34 = vmul.f32 0.03125, %v335_v38 }
  0xeb   : > { %v412_v35 = vpop.xlane.xlu0 %411  ;;  %v565_v41 = vadd.f32 %v1340_v17, %v545_v3  ;;  %v514_v37 = vsub.f32 %v1296_v0, %v350_v22 }
  0xec   : > { %v970_v42 = vpop.eup %969  ;;  %975 = vrsqrt.f32 %v477_v20  ;;  %v430_v43 = vmul.f32 0.03125, %v412_v35  ;;  %v447_v49 = vmul.f32 %v351_v34, %v351_v34  ;;  %v515_v7 = vsub.f32 %v1299_v4, %v351_v34 }
  0xed   : > { %v415_v46 = vpop.xlane.xlu1 %414  ;;  %v576_v48 = vpack.c.bf16 %v565_v41, %v564_v40  ;;  %v526_v9 = vmul.f32 %v970_v42, %v510_v31 }
  0xee   : > { %v972_v32 = vpop.eup %971  ;;  %v462_v27 = vsub.f32 %v430_v43, %v446_v6  ;;  %v431_v26 = vmul.f32 0.03125, %v415_v46 }
  0xef   : > { %v603_v45 = vsel %vm287_vm0, %v576_v48, 0  ;;  %v527_v30 = vmul.f32 %v972_v32, %v511_v44  ;;  %v546_v50 = vmul.f32 %v1333_v5, %v526_v9 }
  0xf0   : > { %v478_v51 = vadd.f32 1e-06, %v462_v27  ;;  %v463_v52 = vsub.f32 %v431_v26, %v447_v49  ;;  %861 = vmatpush3.bf16.xpose.msra.mxu0 %v603_v45 }
  0xf1   : > { %862 = vmatprep.subr.bf16.mxu0 %v1077_v60  ;;  %v547_v53 = vmul.f32 %v1333_v5, %v527_v30  ;;  %v566_v55 = vadd.f32 %v1340_v17, %v546_v50 }
  0xf2   : > { %977 = vrsqrt.f32 %v478_v51  ;;  %v479_v47 = vadd.f32 1e-06, %v463_v52 }
  0xf3   : > { %v567_v58 = vadd.f32 %v1340_v17, %v547_v53 }
  0xf4   : > { %v974_v11 = vpop.eup %973  ;;  %979 = vrsqrt.f32 %v479_v47 }
  0xf5   : > { %v577_v33 = vpack.c.bf16 %v567_v58, %v566_v55  ;;  %v528_v61 = vmul.f32 %v974_v11, %v512_v39 }
  0xf6   : > { %v976_v62 = vpop.eup %975 }
  0xf7   : > { %v606_v63 = vsel %vm287_vm0, %v577_v33, 0  ;;  %v529_v8 = vmul.f32 %v976_v62, %v513_v29  ;;  %v548_v10 = vmul.f32 %v1333_v5, %v528_v61 }
  0xf8   : > { %863 = vmatpush3.bf16.xpose.msra.mxu0 %v606_v63 }
  0xf9   : > { %864 = vmatprep.subr.bf16.mxu0 %v1077_v60  ;;  %v549_v54 = vmul.f32 %v1333_v5, %v529_v8  ;;  %v568_v12 = vadd.f32 %v1340_v17, %v548_v10 }
  0xfb   : > { %v569_v13 = vadd.f32 %v1340_v17, %v549_v54 }
  0xfc   : > { %v978_v56 = vpop.eup %977 }
  0xfd   : > { %v578_v1 = vpack.c.bf16 %v569_v13, %v568_v12  ;;  %v530_v14 = vmul.f32 %v978_v56, %v514_v37 }
  0xfe   : > { %v980_v15 = vpop.eup %979 }
  0xff   : > { %v609_v16 = vsel %vm287_vm0, %v578_v1, 0  ;;  %v531_v19 = vmul.f32 %v980_v15, %v515_v7  ;;  %v550_v18 = vmul.f32 %v1333_v5, %v530_v14 }
 0x100   : > { %865 = vmatpush3.bf16.xpose.msra.mxu0 %v609_v16 }
 0x101   : > { %866 = vmatprep.subr.bf16.mxu0 %v1077_v60  ;;  %v551_v0 = vmul.f32 %v1333_v5, %v531_v19  ;;  %v570_v36 = vadd.f32 %v1340_v17, %v550_v18 }
 0x103   : > { %v571_v4 = vadd.f32 %v1340_v17, %v551_v0 }
 0x105   : > { %v579_v59 = vpack.c.bf16 %v571_v4, %v570_v36 }
 0x107   : > { %v612_v57 = vsel %vm287_vm0, %v579_v59, 0 }
 0x108   : > { %867 = vmatpush3.bf16.xpose.msra.mxu0 %v612_v57 }
 0x10f   : > { %869 = vmatmul.mubr.msk.bf16.vlgmr.msra.gmra.mrb[0].mxu0 %vm287_vm0, %v948_v21 }
 0x1e2   : > { %v648_v60 = vpop.f32.mrb[0].mxu0 }
 0x1e3   : > { %v870_v5 = vpop.f32.mrb[1].mxu0 }
 0x1e4   : > { %v651_v17 = vpop.f32.mrb[2].mxu0 }
 0x1e5   : > { %v834_v23 = vpack.c.bf16 %v651_v17, %v648_v60  ;;  %v871_v24 = vpop.f32.mrb[3].mxu0 }
 0x1e7   : > { %835 = vst [vmem:[%s237_s23] sm:$0xff] %v834_v23  }
 0x1e8   : > { %994 = shalt.err (!%p991_p7)
}
 0x1e9   : > { %s995_s11 = scalar_lea.hbm %s1459_s6, 128  ;;  %s999_s14 = scalar_lea.hbm %s1517_s4, 1024 }
 0x1ea   : > { %p996_p9 = scmp.ne.s32.totalorder %s1459_s6, %s995_s11  ;;  %p1000_p12 = scmp.lt.u32.totalorder %s1459_s6, %s1517_s4 }
 0x1eb   : > { %p1001_p13 = scmp.lt.u32.totalorder %s999_s14, %s995_s11  ;;  %p1003_p1 = scmp.lt.u32.totalorder %s995_s11, %s1459_s6 }
 0x1ec   : > { %p997_p10 = pnand %p996_p9, %p1159_p3 }
 0x1ed   : > { %p1002_p0 = por %p1001_p13, %p1000_p12 }
 0x1ee   : > { %p998_p11 = pneg %p997_p10 }
 0x1ef   : > { %p1004_p2 = por %p1003_p1, %p1002_p0 }
 0x1f1   : > { %p1005_p4 = pnand %p1004_p2, %p998_p11 }
 0x1f3   : > { %1008 = shalt.err (!%p1005_p4)
}
 0x1f4   : > { %s1080_s30 = smov 64   ;;  %s1081_s5 = smov 128  }
 0x1f5   : > { %s1082_s19 = smov 4  }
 0x1f6   : > { %872 = dma.vmem_to_hbm [thread:$0]  (%p1159_p3), %s1454_s24, 128, %s1459_s6, %s1461_s18, %s1080_s30, %s1081_s5, %s1082_s19  }
 0x1f7 PF: > { %p878_p5 = scmp.ge.s32.totalorder %s1075_s22, 2  ;;  %s695_s8 = sand.u32 1, %s1047_s15  }
 0x1f8   : > { %s696_s9 = scalar_lea.sflag [#allocation3], %s695_s8 }
 0x1f9   : > { %p875_p6 = pnand %p878_p5, %p1168_p8 }
 0x1fb   : > { %1042 = dma.done.wait (!%p875_p6), %s696_s9, 128  }
 0x1fc   : > { %1044 = vsyncadd (!%p875_p6), %s696_s9, 4294967168  ;;  %s17_s22 = sadd.s32 1, %s1075_s22   ;;  %s1520_s15 = smov %s1051_s16 }
 0x1fd   : > { %p14_p7 = scmp.ge.s32.totalorder %s17_s22, 10   ;;  %s1521_s16 = smov %s1055_s17 }
 0x1fe   : > { %s1522_s17 = smov %s1177_s7  ;;  %s1523_s18 = smov %s1067_s20 }
 0x1ff   : > { %s1524_s19 = smov %s1071_s21  ;;  %s1525_s20 = smov %s1528_s25 }
 0x200   : > { %s1526_s21 = smov %s1532_s26  ;;  %16 = sbr.rel (!%p14_p7) target bundleno = 5 (0x5), region = 77 }
 0x207   :  { %701 = vsyncpa [#allocation3], 1 }
 0x208   :  { %703 = vsyncpa [#allocation3 + $0x1], 1 }

</bundles_post_ra>
